<compile_context>
chip_gen: v7x
topology: tpu7x:2x2x1
jax: 0.10.0
libtpu: 0.0.40
codegen_flags: <defaults>
</compile_context>

<pallas_src>
import jax
import jax.numpy as jnp
from jax.experimental import pallas as pl
from jax.experimental.pallas import tpu as pltpu


# ---------------------------------------------------------------------------
# Kernels
# ---------------------------------------------------------------------------

def _embed_branch(x_ref, w1_ref, b1_ref, w2_ref, b2_ref):
    """Shared-weight embedding branch: relu(x @ w1 + b1) @ w2 + b2 (f32 out).

    The input activations are cast to bf16 in-kernel (VPU) so both matmuls
    take the MXU's native single-pass bf16 path with f32 accumulation; bias
    adds and ReLU stay in f32.
    """
    x = x_ref[...].astype(jnp.bfloat16)
    h = jnp.dot(x, w1_ref[...], preferred_element_type=jnp.float32)
    h = jnp.maximum(h + b1_ref[...], 0.0)                     # f32 VPU
    out = jnp.dot(h.astype(jnp.bfloat16), w2_ref[...],
                  preferred_element_type=jnp.float32)
    return out + b2_ref[...]


def _siamese_pair_kernel(x1_ref, x2_ref, w1_ref, b1_ref, w2_ref, b2_ref,
                         o1_ref, o2_ref):
    # Weights live in VMEM once; both branches reuse the same refs.
    o1_ref[...] = _embed_branch(x1_ref, w1_ref, b1_ref, w2_ref,
                                b2_ref).astype(o1_ref.dtype)
    o2_ref[...] = _embed_branch(x2_ref, w1_ref, b1_ref, w2_ref,
                                b2_ref).astype(o2_ref.dtype)


def _siamese_single_kernel(x_ref, w1_ref, b1_ref, w2_ref, b2_ref, o_ref):
    o_ref[...] = _embed_branch(x_ref, w1_ref, b1_ref, w2_ref,
                               b2_ref).astype(o_ref.dtype)


# ---------------------------------------------------------------------------
# pallas_call wrappers
# ---------------------------------------------------------------------------

def _vmem_spec():
    return pl.BlockSpec(memory_space=pltpu.MemorySpace.VMEM)


def _cost_estimate(n_rows, d_in, hidden, e_out):
    flops = 2 * n_rows * d_in * hidden + 2 * n_rows * hidden * e_out
    bytes_accessed = (
        n_rows * d_in * 4            # x (f32 in)
        + d_in * hidden * 2          # w1 (bf16)
        + hidden * e_out * 2         # w2 (bf16)
        + hidden * 4 + e_out * 4     # biases (f32)
        + n_rows * e_out * 4         # outputs (f32)
    )
    return pl.CostEstimate(flops=flops, transcendentals=0,
                           bytes_accessed=bytes_accessed)


def siamese_pair_pallas(x1f, x2f, w1, b1, w2, b2):
    """Both siamese branches in ONE grid-less pallas_call (shared weights
    DMA'd once), emitting (out1, out2) directly — no concat / slice ops."""
    b1_, d_in = x1f.shape
    b2_, _ = x2f.shape
    hidden, e_out = w2.shape[0], w2.shape[1]
    return pl.pallas_call(
        _siamese_pair_kernel,
        out_shape=(jax.ShapeDtypeStruct((b1_, e_out), jnp.float32),
                   jax.ShapeDtypeStruct((b2_, e_out), jnp.float32)),
        in_specs=[_vmem_spec()] * 6,
        out_specs=(_vmem_spec(), _vmem_spec()),
        cost_estimate=_cost_estimate(b1_ + b2_, d_in, hidden, e_out),
    )(x1f, x2f, w1, b1, w2, b2)


def siamese_embed_pallas(xf, w1, b1, w2, b2):
    """Single-branch embedding (SiameseNet.get_embedding)."""
    b_, d_in = xf.shape
    hidden, e_out = w2.shape[0], w2.shape[1]
    return pl.pallas_call(
        _siamese_single_kernel,
        out_shape=jax.ShapeDtypeStruct((b_, e_out), jnp.float32),
        in_specs=[_vmem_spec()] * 5,
        out_specs=_vmem_spec(),
        cost_estimate=_cost_estimate(b_, d_in, hidden, e_out),
    )(xf, w1, b1, w2, b2)


# ---------------------------------------------------------------------------
# Module-level forward (SiameseNet.forward / get_embedding)
# ---------------------------------------------------------------------------

@jax.jit
def siamese_net_forward(x1, x2, params):
    """SiameseNet.forward: same embedding net (shared weights) on both inputs.

    Both branches run inside a single kernel launch; x1/x2 go in as separate
    refs and (output1, output2) come out as separate refs — no wrapper-side
    concat, cast, or slicing.  The flattening reshape is a free bitcast."""
    w1, b1, w2, b2 = params
    x1f = x1.reshape(x1.shape[0], -1)
    x2f = x2.reshape(x2.shape[0], -1)
    return siamese_pair_pallas(x1f, x2f, w1, b1, w2, b2)


@jax.jit
def get_embedding(x, params):
    """SiameseNet.get_embedding: single-branch embedding."""
    w1, b1, w2, b2 = params
    xf = x.reshape(x.shape[0], -1)
    return siamese_embed_pallas(xf, w1, b1, w2, b2)


def init_params(key, d_in, hidden, d_out):
    k1, k2, k3, k4 = jax.random.split(key, 4)
    # Matmul operands in bf16 (MXU-native single-pass path, half the weight
    # DMA); biases / accumulation / elementwise stay f32.  This is a
    # documented accuracy-for-bandwidth tradeoff vs. a strict f32 PyTorch net.
    w1 = (jax.random.normal(k1, (d_in, hidden), jnp.float32)
          * (1.0 / jnp.sqrt(d_in))).astype(jnp.bfloat16)
    b1 = jax.random.normal(k2, (1, hidden), jnp.float32) * 0.01
    w2 = (jax.random.normal(k3, (hidden, d_out), jnp.float32)
          * (1.0 / jnp.sqrt(hidden))).astype(jnp.bfloat16)
    b2 = jax.random.normal(k4, (1, d_out), jnp.float32) * 0.01
    return w1, b1, w2, b2


if __name__ == "__main__":
    key = jax.random.PRNGKey(0)
    kx1, kx2, kp = jax.random.split(key, 3)

    # Small NCHW inputs, consistent with an image-pair siamese setup.
    B, C, H, W = 2, 4, 16, 16
    D_IN = C * H * W          # 1024
    HIDDEN = 128
    EMB = 32

    x1 = jax.random.normal(kx1, (B, C, H, W), jnp.float32)
    x2 = jax.random.normal(kx2, (B, C, H, W), jnp.float32)
    params = init_params(kp, D_IN, HIDDEN, EMB)

    out1, out2 = siamese_net_forward(x1, x2, params)
    jax.block_until_ready((out1, out2))

    # Pure-JAX reference of the same embedding net (same bf16 matmul operands,
    # f32 accumulation and f32 elementwise) for a tight numerical cross-check.
    def ref_embed(x):
        w1, b1, w2, b2 = params
        xf = x.reshape(x.shape[0], -1).astype(jnp.bfloat16)
        h = jnp.dot(xf, w1, preferred_element_type=jnp.float32) + b1
        h = jnp.maximum(h, 0.0)
        return jnp.dot(h.astype(jnp.bfloat16), w2,
                       preferred_element_type=jnp.float32) + b2

    r1, r2 = ref_embed(x1), ref_embed(x2)
    assert out1.shape == (B, EMB) and out2.shape == (B, EMB)
    assert jnp.allclose(out1, r1, atol=5e-3, rtol=5e-3)
    assert jnp.allclose(out2, r2, atol=5e-3, rtol=5e-3)

    # Weight sharing sanity: get_embedding matches the fused pair forward.
    g1 = get_embedding(x1, params)
    jax.block_until_ready(g1)
    assert jnp.allclose(g1, out1, atol=5e-3, rtol=5e-3)

    print("KERNEL_OK")
</pallas_src>

<mosaic_0001>
module attributes {stable_mosaic.version = 11 : i64} {
  func.func @_siamese_pair_kernel(%arg0: memref<2x1024xf32, #tpu.memory_space<vmem>>, %arg1: memref<2x1024xf32, #tpu.memory_space<vmem>>, %arg2: memref<1024x128xbf16, #tpu.memory_space<vmem>>, %arg3: memref<1x128xf32, #tpu.memory_space<vmem>>, %arg4: memref<128x32xbf16, #tpu.memory_space<vmem>>, %arg5: memref<1x32xf32, #tpu.memory_space<vmem>>, %arg6: memref<2x32xf32, #tpu.memory_space<vmem>>, %arg7: memref<2x32xf32, #tpu.memory_space<vmem>>) attributes {dimension_semantics = [], scalar_prefetch = 0 : i64, scratch_operands = 0 : i64, tpu.core_type = #tpu.core_type<tc>} {
    %c0 = arith.constant 0 : index
    %c0_0 = arith.constant 0 : index
    %0 = vector.load %arg0[%c0, %c0_0] : memref<2x1024xf32, #tpu.memory_space<vmem>>, vector<2x1024xf32>
    %1 = arith.truncf %0 : vector<2x1024xf32> to vector<2x1024xbf16>
    %c0_1 = arith.constant 0 : index
    %c0_2 = arith.constant 0 : index
    %2 = vector.load %arg2[%c0_1, %c0_2] : memref<1024x128xbf16, #tpu.memory_space<vmem>>, vector<1024x128xbf16>
    %cst = arith.constant dense<0.000000e+00> : vector<2x128xf32>
    %3 = tpu.matmul %1, %2, %cst {dimension_numbers = #tpu.dot_dimension_numbers<[1], [0], [0], [1], [0, 0, 1, 1], [], []>} : vector<2x1024xbf16>, vector<1024x128xbf16>, vector<2x128xf32> -> vector<2x128xf32>
    %c0_3 = arith.constant 0 : index
    %c0_4 = arith.constant 0 : index
    %4 = vector.load %arg3[%c0_3, %c0_4] : memref<1x128xf32, #tpu.memory_space<vmem>>, vector<1x128xf32>
    %5 = vector.broadcast %4 : vector<1x128xf32> to vector<2x128xf32>
    %6 = arith.addf %3, %5 : vector<2x128xf32>
    %cst_5 = arith.constant 0.000000e+00 : f32
    %7 = vector.broadcast %cst_5 : f32 to vector<2x128xf32>
    %8 = arith.maximumf %6, %7 : vector<2x128xf32>
    %9 = arith.truncf %8 : vector<2x128xf32> to vector<2x128xbf16>
    %c0_6 = arith.constant 0 : index
    %c0_7 = arith.constant 0 : index
    %10 = vector.load %arg4[%c0_6, %c0_7] : memref<128x32xbf16, #tpu.memory_space<vmem>>, vector<128x32xbf16>
    %cst_8 = arith.constant dense<0.000000e+00> : vector<2x32xf32>
    %11 = tpu.matmul %9, %10, %cst_8 {dimension_numbers = #tpu.dot_dimension_numbers<[1], [0], [0], [1], [0, 0, 1, 1], [], []>} : vector<2x128xbf16>, vector<128x32xbf16>, vector<2x32xf32> -> vector<2x32xf32>
    %c0_9 = arith.constant 0 : index
    %c0_10 = arith.constant 0 : index
    %12 = vector.load %arg5[%c0_9, %c0_10] : memref<1x32xf32, #tpu.memory_space<vmem>>, vector<1x32xf32>
    %13 = vector.broadcast %12 : vector<1x32xf32> to vector<2x32xf32>
    %14 = arith.addf %11, %13 : vector<2x32xf32>
    %c0_11 = arith.constant 0 : index
    %c0_12 = arith.constant 0 : index
    %15 = vector.load %arg6[%c0_11, %c0_12] : memref<2x32xf32, #tpu.memory_space<vmem>>, vector<2x32xf32>
    tpu.vector_store %arg6[%c0_11, %c0_12], %14 {strides = array<i32>} : memref<2x32xf32, #tpu.memory_space<vmem>>, vector<2x32xf32>,
    %c0_13 = arith.constant 0 : index
    %c0_14 = arith.constant 0 : index
    %16 = vector.load %arg1[%c0_13, %c0_14] : memref<2x1024xf32, #tpu.memory_space<vmem>>, vector<2x1024xf32>
    %17 = arith.truncf %16 : vector<2x1024xf32> to vector<2x1024xbf16>
    %c0_15 = arith.constant 0 : index
    %c0_16 = arith.constant 0 : index
    %18 = vector.load %arg2[%c0_15, %c0_16] : memref<1024x128xbf16, #tpu.memory_space<vmem>>, vector<1024x128xbf16>
    %cst_17 = arith.constant dense<0.000000e+00> : vector<2x128xf32>
    %19 = tpu.matmul %17, %18, %cst_17 {dimension_numbers = #tpu.dot_dimension_numbers<[1], [0], [0], [1], [0, 0, 1, 1], [], []>} : vector<2x1024xbf16>, vector<1024x128xbf16>, vector<2x128xf32> -> vector<2x128xf32>
    %c0_18 = arith.constant 0 : index
    %c0_19 = arith.constant 0 : index
    %20 = vector.load %arg3[%c0_18, %c0_19] : memref<1x128xf32, #tpu.memory_space<vmem>>, vector<1x128xf32>
    %21 = vector.broadcast %20 : vector<1x128xf32> to vector<2x128xf32>
    %22 = arith.addf %19, %21 : vector<2x128xf32>
    %cst_20 = arith.constant 0.000000e+00 : f32
    %23 = vector.broadcast %cst_20 : f32 to vector<2x128xf32>
    %24 = arith.maximumf %22, %23 : vector<2x128xf32>
    %25 = arith.truncf %24 : vector<2x128xf32> to vector<2x128xbf16>
    %c0_21 = arith.constant 0 : index
    %c0_22 = arith.constant 0 : index
    %26 = vector.load %arg4[%c0_21, %c0_22] : memref<128x32xbf16, #tpu.memory_space<vmem>>, vector<128x32xbf16>
    %cst_23 = arith.constant dense<0.000000e+00> : vector<2x32xf32>
    %27 = tpu.matmul %25, %26, %cst_23 {dimension_numbers = #tpu.dot_dimension_numbers<[1], [0], [0], [1], [0, 0, 1, 1], [], []>} : vector<2x128xbf16>, vector<128x32xbf16>, vector<2x32xf32> -> vector<2x32xf32>
    %c0_24 = arith.constant 0 : index
    %c0_25 = arith.constant 0 : index
    %28 = vector.load %arg5[%c0_24, %c0_25] : memref<1x32xf32, #tpu.memory_space<vmem>>, vector<1x32xf32>
    %29 = vector.broadcast %28 : vector<1x32xf32> to vector<2x32xf32>
    %30 = arith.addf %27, %29 : vector<2x32xf32>
    %c0_26 = arith.constant 0 : index
    %c0_27 = arith.constant 0 : index
    %31 = vector.load %arg7[%c0_26, %c0_27] : memref<2x32xf32, #tpu.memory_space<vmem>>, vector<2x32xf32>
    tpu.vector_store %arg7[%c0_26, %c0_27], %30 {strides = array<i32>} : memref<2x32xf32, #tpu.memory_space<vmem>>, vector<2x32xf32>,
    return
  }
}

</mosaic_0001>

<bundles_post_ra>
// kernel: siamese_net_forward.1
= control target key start
LH: loop header
LB: loop body
LE: loop exit
PB: predicated region body
PF: predicated region fallthrough
CT: control target
= control target key end

     0   :  { %13 = vsyncpa [#allocation3], 0  ;;  %s2572_s0 = inlined_call_operand.vmem [shape: f32[2,1024], index: 0, kind: input, shape index: {}]   ;;  %s2573_s1 = inlined_call_operand.vmem [shape: f32[2,1024], index: 1, kind: input, shape index: {}]   ;;  %s2574_s2 = inlined_call_operand.hbm [shape: bf16[1024,128], index: 2, kind: input, shape index: {}]   ;;  %s2575_s3 = inlined_call_operand.vmem [shape: f32[1,128], index: 3, kind: input, shape index: {}]   ;;  %s2576_s4 = inlined_call_operand.vmem [shape: bf16[128,32], index: 4, kind: input, shape index: {}]   ;;  %s2577_s5 = inlined_call_operand.vmem [shape: f32[1,32], index: 5, kind: input, shape index: {}]   ;;  %s2578_s6 = inlined_call_operand.hbm [shape: f32[2,32], index: 6, kind: output, shape index: {0}]   ;;  %s2579_s7 = inlined_call_operand.hbm [shape: f32[2,32], index: 7, kind: output, shape index: {1}]  }
   0x1   :  { %14 = vsyncpa [#allocation4], 0 }
   0x2   :  { %15 = vsyncpa [#allocation7], 0  ;;  %s2376_s24 = smov [#allocation2]   ;;  %s2304_s28 = scalar_lea.hbm %s2574_s2, 8192 }
   0x3   :  { %s25_s25 = sshll.u32 %s2376_s24, 4  ;;  %p2305_p0 = scmp.ne.s32.totalorder %s2574_s2, %s2304_s28  ;;  %s26_s25 = int_to_ptr.vmem [resolvable:$true] %s25_s25 }
   0x4   :  { %p2308_p1 = scmp.lt.u32.totalorder %s2304_s28, %s2574_s2 }
   0x6   :  { %p2310_p2 = pnand %p2308_p1, %p2305_p0 }
   0x8   :  { %2313 = shalt.err (!%p2310_p2)
}
   0x9   :  { %s2314_s10 = scalar_lea.vmem %s26_s25, 8192  ;;  %p2319_p4 = scmp.lt.s32.totalorder %s26_s25, %s26_s25 }
   0xa   :  { %p2315_p3 = scmp.ne.s32.totalorder %s26_s25, %s2314_s10  ;;  %p2320_p5 = scmp.lt.s32.totalorder %s2314_s10, %s2314_s10 }
   0xc   :  { %p2321_p6 = por %p2320_p5, %p2319_p4 }
   0xe   :  { %p2322_p7 = pnand %p2321_p6, %p2315_p3 }
  0x10   :  { %2325 = shalt.err (!%p2322_p7)
}
  0x11   :  { %s2377_s11 = smov 64   ;;  %s2378_s12 = smov 4  }
  0x12   :  { %31 = dma.hbm_to_vmem [thread:$0]  %s2574_s2, 8192, %s26_s25, [#allocation3], %s2377_s11, %s2377_s11, %s2378_s12  }
  0x13   :  { %2370 = dma.done.wait [#allocation3], 8192  }
  0x14   :  { %2371 = vsyncadd [#allocation3], 4294959104  ;;  %v2156_v0 = vld [vmem:[#allocation2 + $0x40] sm:$0xff]   ;;  %v2160_v4 = vld [vmem:[#allocation2 + $0x48] sm:$0xff]   ;;  %v2379_v22 = vmov 1983009808   ;;  %v50_v24 = vlaneseq }
  0x15   :  { %v2157_v1 = vld [vmem:[#allocation2 + $0xc0] sm:$0xff]   ;;  %1914 = vmatprep.subr.bf16.mxu0 %v2156_v0  ;;  %v2161_v5 = vld [vmem:[#allocation2 + $0xc8] sm:$0xff]   ;;  %v2164_v8 = vld [vmem:[#allocation2 + $0x50] sm:$0xff]   ;;  %v48_v23 = vunpack.c.l.s4 %v2379_v22  ;;  %vm2381_vm0 = vmmov 0   ;;  %vm888_vm1 = vcmask 254976  }
  0x16   :  { %v2158_v2 = vld [vmem:[#allocation2] sm:$0xff]   ;;  %1936 = vmatprep.subr.bf16.mxu1 %v2157_v1  ;;  %v2162_v6 = vld [vmem:[#allocation2 + $0x8] sm:$0xff]   ;;  %v2165_v9 = vld [vmem:[#allocation2 + $0xd0] sm:$0xff]   ;;  %v51_v30 = vshrl.u32 %v50_v24, 7 }
  0x17   :  { %v2159_v3 = vld [vmem:[#allocation2 + $0x80] sm:$0xff]   ;;  %1915 = vmatpush3.bf16.msra.mxu0 %v2158_v2  ;;  %v2163_v7 = vld [vmem:[#allocation2 + $0x88] sm:$0xff]   ;;  %v2166_v10 = vld [vmem:[#allocation2 + $0x10] sm:$0xff]   ;;  %v49_v29 = vunpack.c.0.s8 %v48_v23 }
  0x18   :  { %1937 = vmatpush3.bf16.msra.mxu1 %v2159_v3  ;;  %1916 = vmatprep.subr.bf16.mxu0 %v2160_v4  ;;  %v2167_v11 = vld [vmem:[#allocation2 + $0x90] sm:$0xff]   ;;  %v2168_v12 = vld [vmem:[#allocation2 + $0x58] sm:$0xff]   ;;  %v2172_v16 = vld [vmem:[#allocation2 + $0x60] sm:$0xff]  }
  0x19   :  { %1938 = vmatprep.subr.bf16.mxu1 %v2161_v5  ;;  %v2169_v13 = vld [vmem:[#allocation2 + $0xd8] sm:$0xff]   ;;  %v2173_v17 = vld [vmem:[#allocation2 + $0xe0] sm:$0xff]   ;;  %v2176_v20 = vld [vmem:[#allocation2 + $0x68] sm:$0xff]   ;;  %v2436_v35 = vsub.s32 %v49_v29, %v51_v30  ;;  %v2380_v29 = vmov 0.0  }
  0x1a   :  { %v2170_v14 = vld [vmem:[#allocation2 + $0x18] sm:$0xff]   ;;  %v2174_v18 = vld [vmem:[#allocation2 + $0x20] sm:$0xff]   ;;  %v2177_v21 = vld [vmem:[#allocation2 + $0xe8] sm:$0xff]  }
  0x1b   :  { %1917 = vmatpush3.bf16.msra.mxu0 %v2162_v6  ;;  %v2171_v15 = vld [vmem:[#allocation2 + $0x98] sm:$0xff]   ;;  %v2175_v19 = vld [vmem:[#allocation2 + $0xa0] sm:$0xff]   ;;  %v2178_v25 = vld [vmem:[#allocation2 + $0x28] sm:$0xff]  }
  0x1c   :  { %1939 = vmatpush3.bf16.msra.mxu1 %v2163_v7  ;;  %1918 = vmatprep.subr.bf16.mxu0 %v2164_v8  ;;  %v2179_v26 = vld [vmem:[#allocation2 + $0xa8] sm:$0xff]   ;;  %v2180_v27 = vld [vmem:[#allocation2 + $0x70] sm:$0xff]   ;;  %v2184_v33 = vld [vmem:[#allocation2 + $0x78] sm:$0xff]  }
  0x1d   :  { %1940 = vmatprep.subr.bf16.mxu1 %v2165_v9  ;;  %v2181_v28 = vld [vmem:[#allocation2 + $0xf0] sm:$0xff]   ;;  %v2185_v34 = vld [vmem:[#allocation2 + $0xf8] sm:$0xff]   ;;  %v42_v38 = vld [vmem:[%s2572_s0] sm:$0xff] }
  0x1e   :  { %v2182_v31 = vld [vmem:[#allocation2 + $0x30] sm:$0xff]   ;;  %v2186_v36 = vld [vmem:[#allocation2 + $0x38] sm:$0xff]   ;;  %v53_v39 = vrot.slane %v42_v38, %v2436_v35  ;;  %v46_v40 = vcombine.high %v42_v38, %v42_v38  ;;  %v2189_v41 = vld [vmem:[#allocation2 + $0x140] sm:$0xff]  }
  0x1f   :  { %1919 = vmatpush3.bf16.msra.mxu0 %v2166_v10  ;;  %v2183_v32 = vld [vmem:[#allocation2 + $0xb0] sm:$0xff]   ;;  %v2187_v37 = vld [vmem:[#allocation2 + $0xb8] sm:$0xff]   ;;  %v2190_v42 = vld [vmem:[#allocation2 + $0x1c0] sm:$0xff]  }
  0x20   :  { %1941 = vmatpush3.bf16.msra.mxu1 %v2167_v11  ;;  %1920 = vmatprep.subr.bf16.mxu0 %v2168_v12  ;;  %v61_v43 = vcombine.high %v53_v39, %v53_v39  ;;  %v60_v44 = vrot.slane %v46_v40, %v2436_v35  ;;  %v88_v45 = vpack.c.bf16 %v53_v39, %v53_v39  ;;  %v2191_v46 = vld [vmem:[#allocation2 + $0x100] sm:$0xff]   ;;  %v2193_v51 = vld [vmem:[#allocation2 + $0x148] sm:$0xff]   ;;  %v2197_v56 = vld [vmem:[#allocation2 + $0x150] sm:$0xff]  }
  0x21   :  { %1942 = vmatprep.subr.bf16.mxu1 %v2169_v13  ;;  %v2192_v49 = vld [vmem:[#allocation2 + $0x180] sm:$0xff]   ;;  %v2194_v53 = vld [vmem:[#allocation2 + $0x1c8] sm:$0xff]   ;;  %v2198_v57 = vld [vmem:[#allocation2 + $0x1d0] sm:$0xff]  }
  0x22   :  { %v89_v47 = vpack.c.bf16 %v61_v43, %v61_v43  ;;  %v62_v48 = vcombine.high %v60_v44, %v60_v44  ;;  %v90_v50 = vpack.c.bf16 %v60_v44, %v60_v44  ;;  %v2195_v54 = vld [vmem:[#allocation2 + $0x108] sm:$0xff]   ;;  %v2199_v58 = vld [vmem:[#allocation2 + $0x110] sm:$0xff]   ;;  %v2201_v60 = vld [vmem:[#allocation2 + $0x158] sm:$0xff]  }
  0x23   :  { %1921 = vmatpush3.bf16.msra.mxu0 %v2170_v14  ;;  %v2196_v55 = vld [vmem:[#allocation2 + $0x188] sm:$0xff]   ;;  %v2200_v59 = vld [vmem:[#allocation2 + $0x190] sm:$0xff]   ;;  %v2202_v61 = vld [vmem:[#allocation2 + $0x1d8] sm:$0xff]  }
  0x24   :  { %1943 = vmatpush3.bf16.msra.mxu1 %v2171_v15  ;;  %1922 = vmatprep.subr.bf16.mxu0 %v2172_v16  ;;  %v91_v52 = vpack.c.bf16 %v62_v48, %v62_v48  ;;  %v2203_v62 = vld [vmem:[#allocation2 + $0x118] sm:$0xff]   ;;  %v2205_v0 = vld [vmem:[#allocation2 + $0x160] sm:$0xff]   ;;  %v2209_v4 = vld [vmem:[#allocation2 + $0x168] sm:$0xff]  }
  0x25   :  { %1944 = vmatprep.subr.bf16.mxu1 %v2173_v17  ;;  %647 = vmatprep.mubr.bf16.mxu0 %v89_v47  ;;  %v2204_v63 = vld [vmem:[#allocation2 + $0x198] sm:$0xff]   ;;  %v2206_v1 = vld [vmem:[#allocation2 + $0x1e0] sm:$0xff]   ;;  %v2210_v5 = vld [vmem:[#allocation2 + $0x1e8] sm:$0xff]  }
  0x26   :  { %687 = vmatprep.mubr.bf16.mxu1 %v91_v52  ;;  %v2207_v2 = vld [vmem:[#allocation2 + $0x120] sm:$0xff]   ;;  %v2211_v6 = vld [vmem:[#allocation2 + $0x128] sm:$0xff]   ;;  %v2213_v8 = vld [vmem:[#allocation2 + $0x170] sm:$0xff]  }
  0x27   :  { %1923 = vmatpush3.bf16.msra.mxu0 %v2174_v18  ;;  %v2208_v3 = vld [vmem:[#allocation2 + $0x1a0] sm:$0xff]   ;;  %v2212_v7 = vld [vmem:[#allocation2 + $0x1a8] sm:$0xff]   ;;  %v2214_v9 = vld [vmem:[#allocation2 + $0x1f0] sm:$0xff]  }
  0x28   :  { %1945 = vmatpush3.bf16.msra.mxu1 %v2175_v19  ;;  %1924 = vmatprep.subr.bf16.mxu0 %v2176_v20  ;;  %v2215_v10 = vld [vmem:[#allocation2 + $0x130] sm:$0xff]   ;;  %v2217_v12 = vld [vmem:[#allocation2 + $0x178] sm:$0xff]   ;;  %v43_v15 = vld [vmem:[%s2572_s0 + $0x8] sm:$0xff] }
  0x29   :  { %1946 = vmatprep.subr.bf16.mxu1 %v2177_v21  ;;  %v2216_v11 = vld [vmem:[#allocation2 + $0x1b0] sm:$0xff]   ;;  %v2218_v13 = vld [vmem:[#allocation2 + $0x1f8] sm:$0xff]   ;;  %v70_v17 = vrot.slane %v43_v15, %v2436_v35  ;;  %v63_v18 = vcombine.high %v43_v15, %v43_v15  ;;  %v2226_v30 = vld [vmem:[#allocation2 + $0x48] sm:$0xff]  }
  0x2a   :  { %v2219_v14 = vld [vmem:[#allocation2 + $0x138] sm:$0xff]   ;;  %v2235_v40 = vld [vmem:[#allocation2 + $0x60] sm:$0xff]   ;;  %v2237_v43 = vld [vmem:[%s2576_s4 + $0x28] sm:$0xff]  }
  0x2b   :  { %1925 = vmatpush3.bf16.msra.mxu0 %v2178_v25  ;;  %v2220_v16 = vld [vmem:[#allocation2 + $0x1b8] sm:$0xff]   ;;  %v78_v19 = vcombine.high %v70_v17, %v70_v17  ;;  %v77_v20 = vrot.slane %v63_v18, %v2436_v35  ;;  %v92_v21 = vpack.c.bf16 %v70_v17, %v70_v17  ;;  %v2238_v44 = vld [vmem:[#allocation2 + $0x68] sm:$0xff]   ;;  %v2241_v47 = vld [vmem:[#allocation2 + $0x70] sm:$0xff]  }
  0x2c   :  { %1947 = vmatpush3.bf16.msra.mxu1 %v2179_v26  ;;  %1926 = vmatprep.subr.bf16.mxu0 %v2180_v27  ;;  %v2222_v26 = vld [vmem:[%s2576_s4] sm:$0xff]   ;;  %v2231_v38 = vld [vmem:[%s2576_s4 + $0x18] sm:$0xff]   ;;  %v2242_v48 = vld [vmem:[#allocation2 + $0x30] sm:$0xff]  }
  0x2d   :  { %1948 = vmatprep.subr.bf16.mxu1 %v2181_v28  ;;  %v93_v22 = vpack.c.bf16 %v78_v19, %v78_v19  ;;  %v79_v23 = vcombine.high %v77_v20, %v77_v20  ;;  %v94_v24 = vpack.c.bf16 %v77_v20, %v77_v20  ;;  %v2223_v27 = vld [vmem:[#allocation2 + $0x40] sm:$0xff]   ;;  %v2233_v39 = vld [vmem:[#allocation2 + $0x18] sm:$0xff]  }
  0x2e   :  { %v2224_v28 = vld [vmem:[#allocation2] sm:$0xff]  }
  0x2f   :  { %1927 = vmatpush3.bf16.msra.mxu0 %v2182_v31  ;;  %v95_v25 = vpack.c.bf16 %v79_v23, %v79_v23  ;;  %v2225_v31 = vld [vmem:[%s2576_s4 + $0x8] sm:$0xff]  }
  0x30   :  { %1949 = vmatpush3.bf16.msra.mxu1 %v2183_v32  ;;  %1928 = vmatprep.subr.bf16.mxu0 %v2184_v33  ;;  %v2227_v32 = vld [vmem:[#allocation2 + $0x8] sm:$0xff]   ;;  %v2229_v33 = vld [vmem:[#allocation2 + $0x50] sm:$0xff]  }
  0x31   :  { %1950 = vmatprep.subr.bf16.mxu1 %v2185_v34  ;;  %v2228_v34 = vld [vmem:[%s2576_s4 + $0x10] sm:$0xff]  }
  0x33   :  { %1929 = vmatpush3.bf16.msra.mxu0 %v2186_v36  ;;  %v2230_v36 = vld [vmem:[#allocation2 + $0x10] sm:$0xff]  }
  0x34   :  { %1951 = vmatpush3.bf16.msra.mxu1 %v2187_v37  ;;  %1958 = vmatprep.subr.bf16.mxu0 %v2189_v41  ;;  %v2232_v37 = vld [vmem:[#allocation2 + $0x58] sm:$0xff]   ;;  %v2234_v41 = vld [vmem:[%s2576_s4 + $0x20] sm:$0xff]  }
  0x35   :  { %1980 = vmatprep.subr.bf16.mxu1 %v2190_v42  ;;  %v2236_v42 = vld [vmem:[#allocation2 + $0x20] sm:$0xff]  }
  0x36   :  { %648 = vmatmul.mubr.bf16.vlgmr.msra.gmra.mrb[0].mxu0 %v88_v45  ;;  %v2239_v45 = vld [vmem:[#allocation2 + $0x28] sm:$0xff]  }
  0x37   :  { %1959 = vmatpush3.bf16.msra.mxu0 %v2191_v46  ;;  %688 = vmatmul.mubr.bf16.vlgmr.msra.gmra.mrb[0].mxu1 %v90_v50  ;;  %v2240_v46 = vld [vmem:[%s2576_s4 + $0x30] sm:$0xff]   ;;  %v2483_v50 = vld [vmem:[%s2573_s1] sm:$0xff] }
  0x38   :  { %1960 = vmatprep.subr.bf16.mxu0 %v2193_v51  ;;  %1981 = vmatpush3.bf16.msra.mxu1 %v2192_v49  ;;  %v2243_v49 = vld [vmem:[%s2576_s4 + $0x38] sm:$0xff]   ;;  %v901_v52 = vrot.slane %v2483_v50, %v2436_v35 }
  0x39   :  { %1982 = vmatprep.subr.bf16.mxu1 %v2194_v53  ;;  %727 = vmatprep.mubr.bf16.mxu0 %v93_v22  ;;  %v2244_v51 = vld [vmem:[#allocation2 + $0x78] sm:$0xff]  }
  0x3a   :  { %767 = vmatprep.mubr.bf16.mxu1 %v95_v25  ;;  %v2245_v53 = vld [vmem:[#allocation2 + $0x38] sm:$0xff]  }
  0x3b   :  { %1961 = vmatpush3.bf16.msra.mxu0 %v2195_v54  ;;  %v2246_v54 = vld [vmem:[#allocation2 + $0xc0] sm:$0xff]  }
  0x3c   :  { %1962 = vmatprep.subr.bf16.mxu0 %v2197_v56  ;;  %1983 = vmatpush3.bf16.msra.mxu1 %v2196_v55  ;;  %v909_v55 = vcombine.high %v901_v52, %v901_v52 }
  0x3d   :  { %1984 = vmatprep.subr.bf16.mxu1 %v2198_v57  ;;  %v2248_v57 = vld [vmem:[#allocation2 + $0x140] sm:$0xff]  }
  0x3e   :  { %v937_v56 = vpack.c.bf16 %v909_v55, %v909_v55  ;;  %v2262_v55 = vld [vmem:[#allocation2 + $0xe0] sm:$0xff]  }
  0x3f   :  { %1963 = vmatpush3.bf16.msra.mxu0 %v2199_v58  ;;  %v936_v58 = vpack.c.bf16 %v901_v52, %v901_v52  ;;  %v2255_v52 = vld [vmem:[#allocation2 + $0x90] sm:$0xff]  }
  0x40   :  { %1964 = vmatprep.subr.bf16.mxu0 %v2201_v60  ;;  %1985 = vmatpush3.bf16.msra.mxu1 %v2200_v59  ;;  %v2249_v59 = vld [vmem:[#allocation2 + $0x100] sm:$0xff]   ;;  %v2252_v60 = vld [vmem:[#allocation2 + $0x148] sm:$0xff]  }
  0x41   :  { %1986 = vmatprep.subr.bf16.mxu1 %v2202_v61  ;;  %v2253_v61 = vld [vmem:[#allocation2 + $0x108] sm:$0xff]  }
  0x43   :  { %1965 = vmatpush3.bf16.msra.mxu0 %v2203_v62  ;;  %v2256_v62 = vld [vmem:[#allocation2 + $0x150] sm:$0xff]  }
  0x44   :  { %1966 = vmatprep.subr.bf16.mxu0 %v2205_v0  ;;  %1987 = vmatpush3.bf16.msra.mxu1 %v2204_v63  ;;  %v2257_v63 = vld [vmem:[#allocation2 + $0x110] sm:$0xff]   ;;  %v2260_v0 = vld [vmem:[#allocation2 + $0x158] sm:$0xff]  }
  0x45   :  { %1988 = vmatprep.subr.bf16.mxu1 %v2206_v1  ;;  %v2261_v1 = vld [vmem:[#allocation2 + $0x118] sm:$0xff]  }
  0x47   :  { %1967 = vmatpush3.bf16.msra.mxu0 %v2207_v2  ;;  %v2264_v2 = vld [vmem:[#allocation2 + $0x160] sm:$0xff]  }
  0x48   :  { %1968 = vmatprep.subr.bf16.mxu0 %v2209_v4  ;;  %1989 = vmatpush3.bf16.msra.mxu1 %v2208_v3  ;;  %v2265_v3 = vld [vmem:[#allocation2 + $0x120] sm:$0xff]   ;;  %v2268_v4 = vld [vmem:[#allocation2 + $0x168] sm:$0xff]  }
  0x49   :  { %1990 = vmatprep.subr.bf16.mxu1 %v2210_v5  ;;  %v2269_v5 = vld [vmem:[#allocation2 + $0x128] sm:$0xff]  }
  0x4b   :  { %1969 = vmatpush3.bf16.msra.mxu0 %v2211_v6  ;;  %v2272_v6 = vld [vmem:[#allocation2 + $0x170] sm:$0xff]  }
  0x4c   :  { %1970 = vmatprep.subr.bf16.mxu0 %v2213_v8  ;;  %1991 = vmatpush3.bf16.msra.mxu1 %v2212_v7  ;;  %v2273_v7 = vld [vmem:[#allocation2 + $0x130] sm:$0xff]   ;;  %v2492_v8 = vld [vmem:[%s2573_s1 + $0x8] sm:$0xff] }
  0x4d   :  { %1992 = vmatprep.subr.bf16.mxu1 %v2214_v9  ;;  %v918_v9 = vrot.slane %v2492_v8, %v2436_v35 }
  0x4f   :  { %1971 = vmatpush3.bf16.msra.mxu0 %v2215_v10  ;;  %v2276_v10 = vld [vmem:[#allocation2 + $0x178] sm:$0xff]  }
  0x50   :  { %1972 = vmatprep.subr.bf16.mxu0 %v2217_v12  ;;  %1993 = vmatpush3.bf16.msra.mxu1 %v2216_v11  ;;  %v2278_v11 = vld [vmem:[#allocation2 + $0x138] sm:$0xff]   ;;  %v926_v12 = vcombine.high %v918_v9, %v918_v9 }
  0x51   :  { %1994 = vmatprep.subr.bf16.mxu1 %v2218_v13 }
  0x52   :  { %v941_v13 = vpack.c.bf16 %v926_v12, %v926_v12  ;;  %v2288_v12 = vld [vmem:[#allocation2 + $0x1a0] sm:$0xff]  }
  0x53   :  { %1973 = vmatpush3.bf16.msra.mxu0 %v2219_v14  ;;  %v940_v14 = vpack.c.bf16 %v918_v9, %v918_v9  ;;  %v2285_v9 = vld [vmem:[#allocation2 + $0x1d8] sm:$0xff]  }
  0x54   :  { %1995 = vmatpush3.bf16.msra.mxu1 %v2220_v16  ;;  %2108 = vmatprep.subr.bf16.mxu0 %v2380_v29  ;;  %v2502_v16 = vld [vmem:[%s2575_s3] ss:$0 sm:$0xff] }
  0x55   :  { %2011 = vmatprep.subr.bf16.mxu1 %v2223_v27 }
  0x56   :  { %728 = vmatmul.mubr.bf16.vlgmr.msra.gmra.mrb[4].mxu0 %v92_v21 }
  0x57   :  { %768 = vmatmul.mubr.bf16.vlgmr.msra.gmra.mrb[4].mxu1 %v94_v24  ;;  %2109 = vmatpush3.bf16.msra.mxu0 %v2222_v26 }
  0x58   :  { %2012 = vmatpush3.bf16.msra.mxu1 %v2224_v28  ;;  %2110 = vmatprep.subr.bf16.mxu0 %v2380_v29  ;;  %v894_v28 = vcombine.high %v2483_v50, %v2483_v50  ;;  %v2251_v50 = vld [vmem:[#allocation2 + $0x88] sm:$0xff]  }
  0x59   :  { %2013 = vmatprep.subr.bf16.mxu1 %v2226_v30  ;;  %2124 = vmatprep.mubr.msk.bf16.mxu0 %vm2381_vm0, %v2380_v29 }
  0x5a   :  { %1495 = vmatprep.mubr.bf16.mxu1 %v937_v56  ;;  %v2263_v56 = vld [vmem:[#allocation2 + $0xa0] sm:$0xff]  }
  0x5b   :  { %2111 = vmatpush3.bf16.msra.mxu0 %v2225_v31 }
  0x5c   :  { %2014 = vmatpush3.bf16.msra.mxu1 %v2227_v32  ;;  %2112 = vmatprep.subr.bf16.mxu0 %v2380_v29  ;;  %v908_v32 = vrot.slane %v894_v28, %v2436_v35 }
  0x5d   :  { %2015 = vmatprep.subr.bf16.mxu1 %v2229_v33 }
  0x5f   :  { %2113 = vmatpush3.bf16.msra.mxu0 %v2228_v34 }
  0x60   :  { %2016 = vmatpush3.bf16.msra.mxu1 %v2230_v36  ;;  %2114 = vmatprep.subr.bf16.mxu0 %v2380_v29 }
  0x61   :  { %2017 = vmatprep.subr.bf16.mxu1 %v2232_v37 }
  0x63   :  { %2115 = vmatpush3.bf16.msra.mxu0 %v2231_v38 }
  0x64   :  { %2018 = vmatpush3.bf16.msra.mxu1 %v2233_v39  ;;  %2116 = vmatprep.subr.bf16.mxu0 %v2380_v29 }
  0x65   :  { %2019 = vmatprep.subr.bf16.mxu1 %v2235_v40 }
  0x67   :  { %2117 = vmatpush3.bf16.msra.mxu0 %v2234_v41 }
  0x68   :  { %2020 = vmatpush3.bf16.msra.mxu1 %v2236_v42  ;;  %2118 = vmatprep.subr.bf16.mxu0 %v2380_v29 }
  0x69   :  { %2021 = vmatprep.subr.bf16.mxu1 %v2238_v44 }
  0x6b   :  { %2119 = vmatpush3.bf16.msra.mxu0 %v2237_v43  ;;  %v910_v43 = vcombine.high %v908_v32, %v908_v32 }
  0x6c   :  { %2120 = vmatprep.subr.bf16.mxu0 %v2380_v29  ;;  %2022 = vmatpush3.bf16.msra.mxu1 %v2239_v45 }
  0x6d   :  { %2023 = vmatprep.subr.bf16.mxu1 %v2241_v47  ;;  %v939_v47 = vpack.c.bf16 %v910_v43, %v910_v43 }
  0x6f   :  { %2121 = vmatpush3.bf16.msra.mxu0 %v2240_v46  ;;  %v2247_v46 = vld [vmem:[#allocation2 + $0x80] sm:$0xff]  }
  0x70   :  { %2122 = vmatprep.subr.bf16.mxu0 %v2380_v29  ;;  %2024 = vmatpush3.bf16.msra.mxu1 %v2242_v48 }
  0x71   :  { %2025 = vmatprep.subr.bf16.mxu1 %v2244_v51  ;;  %v2254_v51 = vld [vmem:[#allocation2 + $0xd0] sm:$0xff]  }
  0x73   :  { %2123 = vmatpush3.bf16.msra.mxu0 %v2243_v49  ;;  %v2250_v49 = vld [vmem:[#allocation2 + $0xc8] sm:$0xff]  }
  0x74   :  { %2026 = vmatpush3.bf16.msra.mxu1 %v2245_v53  ;;  %2033 = vmatprep.subr.bf16.mxu0 %v2246_v54  ;;  %v2258_v53 = vld [vmem:[#allocation2 + $0xd8] sm:$0xff]  }
  0x75   :  { %2055 = vmatprep.subr.bf16.mxu1 %v2248_v57  ;;  %v2259_v54 = vld [vmem:[#allocation2 + $0x98] sm:$0xff]   ;;  %v2266_v57 = vld [vmem:[#allocation2 + $0xe8] sm:$0xff]  }
  0x77   :  { %1496 = vmatmul.mubr.bf16.vlgmr.msra.gmra.mrb[8].mxu1 %v936_v58  ;;  %v2267_v58 = vld [vmem:[#allocation2 + $0xa8] sm:$0xff]  }
  0x78   :  { %2056 = vmatpush3.bf16.msra.mxu1 %v2249_v59  ;;  %1575 = vmatprep.mubr.bf16.mxu1 %v941_v13  ;;  %v911_v59 = vcombine.high %v2492_v8, %v2492_v8  ;;  %v2283_v8 = vld [vmem:[#allocation2 + $0x1d0] sm:$0xff]   ;;  %v2289_v13 = vld [vmem:[#allocation2 + $0x1e8] sm:$0xff]  }
  0x79   :  { %2057 = vmatprep.subr.bf16.mxu1 %v2252_v60  ;;  %v2270_v60 = vld [vmem:[#allocation2 + $0xf0] sm:$0xff]  }
  0x7c   :  { %2058 = vmatpush3.bf16.msra.mxu1 %v2253_v61  ;;  %v2271_v61 = vld [vmem:[#allocation2 + $0xb0] sm:$0xff]  }
  0x7d   :  { %2059 = vmatprep.subr.bf16.mxu1 %v2256_v62  ;;  %v925_v62 = vrot.slane %v911_v59, %v2436_v35  ;;  %v2284_v35 = vld [vmem:[#allocation2 + $0x190] sm:$0xff]  }
  0x80   :  { %2060 = vmatpush3.bf16.msra.mxu1 %v2257_v63  ;;  %v2274_v63 = vld [vmem:[#allocation2 + $0xf8] sm:$0xff]  }
  0x81   :  { %2061 = vmatprep.subr.bf16.mxu1 %v2260_v0  ;;  %v2275_v0 = vld [vmem:[#allocation2 + $0xb8] sm:$0xff]  }
  0x84   :  { %2062 = vmatpush3.bf16.msra.mxu1 %v2261_v1  ;;  %v927_v1 = vcombine.high %v925_v62, %v925_v62 }
  0x85   :  { %2063 = vmatprep.subr.bf16.mxu1 %v2264_v2  ;;  %v2279_v2 = vld [vmem:[#allocation2 + $0x1c0] sm:$0xff]  }
  0x88   :  { %2064 = vmatpush3.bf16.msra.mxu1 %v2265_v3  ;;  %v938_v3 = vpack.c.bf16 %v908_v32, %v908_v32 }
  0x89   :  { %2065 = vmatprep.subr.bf16.mxu1 %v2268_v4  ;;  %v2280_v4 = vld [vmem:[#allocation2 + $0x180] sm:$0xff]  }
  0x8c   :  { %2066 = vmatpush3.bf16.msra.mxu1 %v2269_v5  ;;  %v943_v5 = vpack.c.bf16 %v927_v1, %v927_v1 }
  0x8d   :  { %2067 = vmatprep.subr.bf16.mxu1 %v2272_v6  ;;  %v2281_v6 = vld [vmem:[#allocation2 + $0x1c8] sm:$0xff]  }
  0x90   :  { %2068 = vmatpush3.bf16.msra.mxu1 %v2273_v7  ;;  %v2282_v7 = vld [vmem:[#allocation2 + $0x188] sm:$0xff]  }
  0x91   :  { %2069 = vmatprep.subr.bf16.mxu1 %v2276_v10  ;;  %v2286_v10 = vld [vmem:[#allocation2 + $0x198] sm:$0xff]  }
  0x94   :  { %2070 = vmatpush3.bf16.msra.mxu1 %v2278_v11  ;;  %v2287_v11 = vld [vmem:[#allocation2 + $0x1e0] sm:$0xff]  }
  0x95   :  { %2128 = vmatprep.subr.bf16.mxu1 %v2380_v29 }
  0x97   :  { %1576 = vmatmul.mubr.bf16.vlgmr.msra.gmra.mrb[12].mxu1 %v940_v14  ;;  %v2290_v14 = vld [vmem:[#allocation2 + $0x1a8] sm:$0xff]  }
  0x98   :  { %2144 = vmatprep.mubr.msk.bf16.mxu1 %vm2381_vm0, %v2380_v29 }
 0x109   :  { %v1930_v15 = vpop.f32.mrb[0].mxu0 }
 0x10a   :  { %v1931_v17 = vpop.f32.mrb[1].mxu0  ;;  %v1952_v18 = vpop.f32.mrb[0].mxu1 }
 0x10b   :  { %v1932_v19 = vadd.f32 %v1931_v17, %v1930_v15  ;;  %v1933_v20 = vpop.f32.mrb[2].mxu0  ;;  %v1953_v21 = vpop.f32.mrb[1].mxu1  ;;  %v2291_v15 = vld [vmem:[#allocation2 + $0x1f0] sm:$0xff]  }
 0x10c   :  { %v1934_v22 = vpop.f32.mrb[3].mxu0  ;;  %v1954_v24 = vadd.f32 %v1953_v21, %v1952_v18  ;;  %v1955_v25 = vpop.f32.mrb[2].mxu1  ;;  %v2292_v17 = vld [vmem:[#allocation2 + $0x1b0] sm:$0xff]   ;;  %v2293_v18 = vld [vmem:[#allocation2 + $0x1f8] sm:$0xff]   ;;  %v942_v20 = vpack.c.bf16 %v925_v62, %v925_v62 }
 0x10d   :  { %v650_v23 = vadd.f32 %v1932_v19, %v2502_v16  ;;  %v1956_v26 = vpop.f32.mrb[3].mxu1  ;;  %v2294_v19 = vld [vmem:[#allocation2 + $0x1b8] sm:$0xff]  }
 0x10f   :  { %v690_v27 = vadd.f32 %v1954_v24, %v650_v23 }
 0x129   :  { %v1974_v30 = vpop.f32.mrb[4].mxu0 }
 0x12a   :  { %v1975_v31 = vpop.f32.mrb[5].mxu0  ;;  %v1996_v33 = vpop.f32.mrb[4].mxu1 }
 0x12b   :  { %v1976_v34 = vadd.f32 %v1975_v31, %v1974_v30  ;;  %v1977_v36 = vpop.f32.mrb[6].mxu0  ;;  %v1997_v37 = vpop.f32.mrb[5].mxu1  ;;  %v2296_v30 = vld [vmem:[%s2576_s4] sm:$0xff]  }
 0x12c   :  { %v1978_v38 = vpop.f32.mrb[7].mxu0  ;;  %v1998_v40 = vadd.f32 %v1997_v37, %v1996_v33  ;;  %v1999_v41 = vpop.f32.mrb[6].mxu1  ;;  %2129 = vmatpush3.bf16.msra.mxu1 %v2296_v30  ;;  %v2297_v33 = vld [vmem:[%s2576_s4 + $0x8] sm:$0xff]   ;;  %v2299_v36 = vld [vmem:[%s2576_s4 + $0x18] sm:$0xff]   ;;  %v2300_v37 = vld [vmem:[%s2576_s4 + $0x20] sm:$0xff]  }
 0x12d   :  { %v730_v39 = vadd.f32 %v1976_v34, %v690_v27  ;;  %v2000_v42 = vpop.f32.mrb[7].mxu1  ;;  %2130 = vmatprep.subr.bf16.mxu1 %v2380_v29  ;;  %v2298_v34 = vld [vmem:[%s2576_s4 + $0x10] sm:$0xff]   ;;  %v2301_v38 = vld [vmem:[%s2576_s4 + $0x28] sm:$0xff]   ;;  %v1831_v41 = vld [vmem:[%s2577_s5] ss:$0 sm:$0xff] }
 0x12f   :  { %v770_v44 = vadd.f32 %v1998_v40, %v730_v39  ;;  %v2302_v39 = vld [vmem:[%s2576_s4 + $0x30] sm:$0xff]   ;;  %v2303_v40 = vld [vmem:[%s2576_s4 + $0x38] sm:$0xff]   ;;  %s2382_s4 = smov [#allocation5]  }
 0x130   :  { %2131 = vmatpush3.bf16.msra.mxu1 %v2297_v33  ;;  %s1743_s5 = sshll.u32 %s2382_s4, 4  ;;  %s1744_s5 = int_to_ptr.vmem [resolvable:$true] %s1743_s5 }
 0x131   :  { %v775_v45 = vmax.f32 %v770_v44, 0.0  ;;  %2132 = vmatprep.subr.bf16.mxu1 %v2380_v29  ;;  %s2326_s30 = scalar_lea.vmem %s1744_s5, 32  ;;  %p2331_p9 = scmp.lt.s32.totalorder %s1744_s5, %s1744_s5 }
 0x132   :  { %p2327_p8 = scmp.ne.s32.totalorder %s1744_s5, %s2326_s30  ;;  %p2332_p10 = scmp.lt.s32.totalorder %s2326_s30, %s2326_s30 }
 0x133   :  { %v776_v48 = vpack.c.bf16 %v775_v45, %v775_v45 }
 0x134   :  { %2133 = vmatpush3.bf16.msra.mxu1 %v2298_v34  ;;  %p2333_p11 = por %p2332_p10, %p2331_p9 }
 0x135   :  { %2125 = vmatmul.mubr.bf16.vlgmr.msra.gmra.mrb[8].mxu0 %v776_v48  ;;  %2134 = vmatprep.subr.bf16.mxu1 %v2380_v29 }
 0x136   :  { %2034 = vmatpush3.bf16.msra.mxu0 %v2247_v46  ;;  %1535 = vmatprep.mubr.bf16.mxu0 %v939_v47  ;;  %p2334_p12 = pnand %p2333_p11, %p2327_p8 }
 0x137   :  { %2035 = vmatprep.subr.bf16.mxu0 %v2250_v49 }
 0x138   :  { %2135 = vmatpush3.bf16.msra.mxu1 %v2299_v36 }
 0x139   :  { %2136 = vmatprep.subr.bf16.mxu1 %v2380_v29 }
 0x13a   :  { %2036 = vmatpush3.bf16.msra.mxu0 %v2251_v50 }
 0x13b   :  { %2037 = vmatprep.subr.bf16.mxu0 %v2254_v51 }
 0x13c   :  { %2137 = vmatpush3.bf16.msra.mxu1 %v2300_v37 }
 0x13d   :  { %2138 = vmatprep.subr.bf16.mxu1 %v2380_v29 }
 0x13e   :  { %2038 = vmatpush3.bf16.msra.mxu0 %v2255_v52 }
 0x13f   :  { %2039 = vmatprep.subr.bf16.mxu0 %v2258_v53 }
 0x140   :  { %2139 = vmatpush3.bf16.msra.mxu1 %v2301_v38 }
 0x141   :  { %2140 = vmatprep.subr.bf16.mxu1 %v2380_v29 }
 0x142   :  { %2040 = vmatpush3.bf16.msra.mxu0 %v2259_v54 }
 0x143   :  { %2041 = vmatprep.subr.bf16.mxu0 %v2262_v55 }
 0x144   :  { %2141 = vmatpush3.bf16.msra.mxu1 %v2302_v39 }
 0x145   :  { %2142 = vmatprep.subr.bf16.mxu1 %v2380_v29 }
 0x146   :  { %2042 = vmatpush3.bf16.msra.mxu0 %v2263_v56 }
 0x147   :  { %2043 = vmatprep.subr.bf16.mxu0 %v2266_v57 }
 0x148   :  { %2143 = vmatpush3.bf16.msra.mxu1 %v2303_v40 }
 0x14a   :  { %2044 = vmatpush3.bf16.msra.mxu0 %v2267_v58  ;;  %v2027_v21 = vpop.f32.mrb[8].mxu1 }
 0x14b   :  { %2045 = vmatprep.subr.bf16.mxu0 %v2270_v60  ;;  %v2028_v22 = vpop.f32.mrb[9].mxu1 }
 0x14c   :  { %v2029_v23 = vadd.f32 %v2028_v22, %v2027_v21  ;;  %v2030_v24 = vpop.f32.mrb[10].mxu1 }
 0x14d   :  { %v2031_v25 = vpop.f32.mrb[11].mxu1 }
 0x14e   :  { %2046 = vmatpush3.bf16.msra.mxu0 %v2271_v61  ;;  %v1498_v47 = vadd.f32 %v2029_v23, %v2502_v16 }
 0x14f   :  { %2047 = vmatprep.subr.bf16.mxu0 %v2274_v63 }
 0x152   :  { %2048 = vmatpush3.bf16.msra.mxu0 %v2275_v0 }
 0x153   :  { %2077 = vmatprep.subr.bf16.mxu0 %v2279_v2 }
 0x155   :  { %1536 = vmatmul.mubr.bf16.vlgmr.msra.gmra.mrb[12].mxu0 %v938_v3 }
 0x156   :  { %2078 = vmatpush3.bf16.msra.mxu0 %v2280_v4  ;;  %1615 = vmatprep.mubr.bf16.mxu0 %v943_v5 }
 0x157   :  { %2079 = vmatprep.subr.bf16.mxu0 %v2281_v6 }
 0x15a   :  { %2080 = vmatpush3.bf16.msra.mxu0 %v2282_v7 }
 0x15b   :  { %2081 = vmatprep.subr.bf16.mxu0 %v2283_v8 }
 0x15e   :  { %2082 = vmatpush3.bf16.msra.mxu0 %v2284_v35 }
 0x15f   :  { %2083 = vmatprep.subr.bf16.mxu0 %v2285_v9 }
 0x162   :  { %2084 = vmatpush3.bf16.msra.mxu0 %v2286_v10 }
 0x163   :  { %2085 = vmatprep.subr.bf16.mxu0 %v2287_v11 }
 0x166   :  { %2086 = vmatpush3.bf16.msra.mxu0 %v2288_v12 }
 0x167   :  { %2087 = vmatprep.subr.bf16.mxu0 %v2289_v13 }
 0x16a   :  { %2088 = vmatpush3.bf16.msra.mxu0 %v2290_v14  ;;  %v2071_v26 = vpop.f32.mrb[12].mxu1 }
 0x16b   :  { %2089 = vmatprep.subr.bf16.mxu0 %v2291_v15  ;;  %v2072_v27 = vpop.f32.mrb[13].mxu1 }
 0x16c   :  { %v2073_v28 = vadd.f32 %v2072_v27, %v2071_v26  ;;  %v2074_v31 = vpop.f32.mrb[14].mxu1 }
 0x16d   :  { %v2075_v32 = vpop.f32.mrb[15].mxu1 }
 0x16e   :  { %2090 = vmatpush3.bf16.msra.mxu0 %v2292_v17 }
 0x16f   :  { %2091 = vmatprep.subr.bf16.mxu0 %v2293_v18 }
 0x172   :  { %2092 = vmatpush3.bf16.msra.mxu0 %v2294_v19 }
 0x175   :  { %1616 = vmatmul.mubr.bf16.vlgmr.msra.gmra.mrb[16].mxu0 %v942_v20 }
 0x208   :  { %v882_v42 = vpop.f32.mrb[8].mxu0 }
 0x209   :  { %v883_v43 = vadd.f32 %v1831_v41, %v882_v42  ;;  %v2126_v44 = vpop.f32.mrb[9].mxu0 }
 0x20a   :  { %v885_v45 = vpop.f32.mrb[10].mxu0 }
 0x20b   :  { %v2127_v46 = vpop.f32.mrb[11].mxu0  ;;  %889 = vst.msk [vmem:[#allocation5] sm:$0x3] %vm888_vm1, %v883_v43 }
 0x228   :  { %v2049_v29 = vpop.f32.mrb[12].mxu0 }
 0x229   :  { %v2050_v48 = vpop.f32.mrb[13].mxu0 }
 0x22a   :  { %v2051_v49 = vadd.f32 %v2050_v48, %v2049_v29  ;;  %v2052_v50 = vpop.f32.mrb[14].mxu0 }
 0x22b   :  { %v2053_v51 = vpop.f32.mrb[15].mxu0 }
 0x22c   :  { %v1538_v52 = vadd.f32 %v2051_v49, %v1498_v47 }
 0x22e   :  { %v1578_v53 = vadd.f32 %v2073_v28, %v1538_v52 }
 0x248   :  { %v2093_v54 = vpop.f32.mrb[16].mxu0 }
 0x249   :  { %v2094_v55 = vpop.f32.mrb[17].mxu0 }
 0x24a   :  { %v2095_v56 = vadd.f32 %v2094_v55, %v2093_v54  ;;  %v2096_v57 = vpop.f32.mrb[18].mxu0 }
 0x24b   :  { %v2097_v58 = vpop.f32.mrb[19].mxu0 }
 0x24c   :  { %v1618_v59 = vadd.f32 %v2095_v56, %v1578_v53 }
 0x24e   :  { %v1623_v60 = vmax.f32 %v1618_v59, 0.0 }
 0x250   :  { %v1624_v61 = vpack.c.bf16 %v1623_v60, %v1623_v60 }
 0x252   :  { %2145 = vmatmul.mubr.bf16.vlgmr.msra.gmra.mrb[16].mxu1 %v1624_v61 }
 0x253   :  { %2337 = shalt.err (!%p2334_p12)
}
 0x254   :  { %s2338_s10 = scalar_lea.hbm %s2578_s6, 32 }
 0x255   :  { %p2339_p13 = scmp.ne.s32.totalorder %s2578_s6, %s2338_s10  ;;  %p2342_p0 = scmp.lt.u32.totalorder %s2338_s10, %s2578_s6 }
 0x257   :  { %p2344_p1 = pnand %p2342_p0, %p2339_p13 }
 0x259   :  { %2347 = shalt.err (!%p2344_p1)
}
 0x25a   :  { %1746 = dma.vmem_to_hbm [thread:$0]  %s1744_s5, 32, %s2578_s6, [#allocation4]  }
 0x25b   :  { %s2383_s2 = smov [#allocation6]  }
 0x25c   :  { %s1753_s15 = sshll.u32 %s2383_s2, 4  ;;  %s1754_s15 = int_to_ptr.vmem [resolvable:$true] %s1753_s15 }
 0x25d   :  { %s2348_s16 = scalar_lea.vmem %s1754_s15, 32  ;;  %p2353_p3 = scmp.lt.s32.totalorder %s1754_s15, %s1754_s15 }
 0x25e   :  { %p2349_p2 = scmp.ne.s32.totalorder %s1754_s15, %s2348_s16  ;;  %p2354_p4 = scmp.lt.s32.totalorder %s2348_s16, %s2348_s16 }
 0x260   :  { %p2355_p5 = por %p2354_p4, %p2353_p3 }
 0x262   :  { %p2356_p6 = pnand %p2355_p5, %p2349_p2 }
 0x325   :  { %v1730_v16 = vpop.f32.mrb[16].mxu1 }
 0x326   :  { %v1731_v62 = vadd.f32 %v1831_v41, %v1730_v16  ;;  %v2146_v63 = vpop.f32.mrb[17].mxu1 }
 0x327   :  { %v1733_v0 = vpop.f32.mrb[18].mxu1 }
 0x328   :  { %v2147_v1 = vpop.f32.mrb[19].mxu1  ;;  %1736 = vst.msk [vmem:[#allocation6] sm:$0x3] %vm888_vm1, %v1731_v62 }
 0x329   :  { %2359 = shalt.err (!%p2356_p6)
}
 0x32a   :  { %s2360_s6 = scalar_lea.hbm %s2579_s7, 32 }
 0x32b   :  { %p2361_p7 = scmp.ne.s32.totalorder %s2579_s7, %s2360_s6  ;;  %p2364_p8 = scmp.lt.u32.totalorder %s2360_s6, %s2579_s7 }
 0x32d   :  { %p2366_p9 = pnand %p2364_p8, %p2361_p7 }
 0x32f   :  { %2369 = shalt.err (!%p2366_p9)
}
 0x330   :  { %1756 = dma.vmem_to_hbm [thread:$0]  %s1754_s15, 32, %s2579_s7, [#allocation7]  }
 0x331   :  { %2372 = dma.done.wait [#allocation4], 32  }
 0x332   :  { %2373 = vsyncadd [#allocation4], 4294967264 }
 0x333   :  { %2374 = dma.done.wait [#allocation7], 32  }
 0x334   :  { %2375 = vsyncadd [#allocation7], 4294967264 }
 0x335   :  { %1763 = vsyncpa [#allocation3], 1 }
 0x336   :  { %1764 = vsyncpa [#allocation4], 1 }
 0x337   :  { %1765 = vsyncpa [#allocation7], 1 }

</bundles_post_ra>
